<compile_context>
chip_gen: v5e
topology: v5e:2x2
jax: 0.10.0
libtpu: 0.0.40
codegen_flags: <defaults>
</compile_context>

<pallas_src>
import functools

import jax
import jax.numpy as jnp
from jax.experimental import pallas as pl
from jax.experimental.pallas import tpu as pltpu


_SMALL_C_MAX = 32   # below this, VPU multiply-adds beat a tiny (K=C, N=C) matmul


def _attention_kernel_vpu(w_ref, b_ref, x_ref, o_ref, *, channels):
    """Small-C path.  w_ref: SMEM (C*C,), b_ref: SMEM (C,), x_ref/o_ref: (1, C, T)."""
    x = x_ref[0].astype(jnp.float32)                        # (C, T), lane axis = T
    rows = []
    for o in range(channels):
        # logits[o, :] = sum_c W[o, c] * x[c, :] + b[o]   (scalar * lane-dense vector)
        acc = x[0:1, :] * w_ref[o * channels + 0]
        for c in range(1, channels):
            acc = acc + x[c:c + 1, :] * w_ref[o * channels + c]
        acc = acc + b_ref[o]
        rows.append(x[o:o + 1, :] * jax.nn.sigmoid(acc))    # gate channel o
    o_ref[0] = jnp.concatenate(rows, axis=0).astype(o_ref.dtype)


def _attention_kernel_mxu(x_ref, w_ref, b_ref, o_ref):
    """Large-C path.  x_ref/o_ref: (1, C, T); w_ref: (C, C); b_ref: (C, 1)."""
    x = x_ref[0].astype(jnp.float32)                        # (C, T)
    w = w_ref[...].astype(jnp.float32)                      # (C, C)
    logits = jnp.dot(w, x, preferred_element_type=jnp.float32) \
        + b_ref[...].astype(jnp.float32)
    o_ref[0] = (x * jax.nn.sigmoid(logits)).astype(o_ref.dtype)


def _choose_tile_hw(hw, channels, itemsize):
    """Pick a lane-dense spatial tile: multiple of 128, ~<=2 MiB of x per tile."""
    max_bytes = 2 * 1024 * 1024
    max_lanes = max(128, (max_bytes // max(1, channels * itemsize)) // 128 * 128)
    if hw <= max_lanes:
        return hw                # single full-HW block (full-extent dims always legal)
    for t in range(max_lanes, 127, -128):
        if hw % t == 0:
            return t
    # TODO(synk): no clean multiple-of-128 divisor; rely on Pallas masking of the
    # partial last block (safe here: compute is elementwise along the lane axis).
    return max_lanes


def attention_layer(x_nchw, weight, bias):
    """x_nchw: (B, C, H, W); weight: (C, C, 1, 1); bias: (C,).  out = x * sigmoid(conv1x1(x))."""
    B, C, H, W = x_nchw.shape
    HW = H * W
    x3 = x_nchw.reshape(B, C, HW)                 # pure reshape, no HBM transpose
    itemsize = jnp.dtype(x_nchw.dtype).itemsize

    tile_hw = _choose_tile_hw(HW, C, itemsize)
    grid = (B, pl.cdiv(HW, tile_hw))

    cost = pl.CostEstimate(
        flops=2 * B * HW * C * C + 2 * B * HW * C,
        transcendentals=B * HW * C,                       # sigmoid exp per element
        bytes_accessed=2 * B * C * HW * itemsize + C * C * 4 + C * 4,
    )
    cparams = pltpu.CompilerParams(
        dimension_semantics=("parallel", "parallel"),     # shards across v7x's 2 TCs
        vmem_limit_bytes=32 * 1024 * 1024,                # explicit, with headroom on v7x
    )
    out_shape = jax.ShapeDtypeStruct((B, C, HW), x_nchw.dtype)
    # Lane-dense blocks: (1, C, tile_hw); last dim is a multiple of 128.
    x_spec = pl.BlockSpec((1, C, tile_hw), lambda b, j, *_: (b, 0, j))
    o_spec = pl.BlockSpec((1, C, tile_hw), lambda b, j, *_: (b, 0, j))

    if C <= _SMALL_C_MAX:
        # Weights/bias live in SMEM via scalar prefetch; no per-tile DMA for them.
        w_flat = weight.reshape(C * C).astype(jnp.float32)
        b_vec = bias.reshape(C).astype(jnp.float32)
        out3 = pl.pallas_call(
            functools.partial(_attention_kernel_vpu, channels=C),
            out_shape=out_shape,
            grid_spec=pltpu.PrefetchScalarGridSpec(
                num_scalar_prefetch=2,
                grid=grid,
                in_specs=[x_spec],
                out_specs=o_spec,
            ),
            compiler_params=cparams,
            cost_estimate=cost,
        )(w_flat, b_vec, x3)
    else:
        # Large C: MXU matmul with a resident (constant index_map) weight block.
        w_mat = weight.reshape(C, C)
        b_col = bias.reshape(C, 1)
        out3 = pl.pallas_call(
            _attention_kernel_mxu,
            out_shape=out_shape,
            grid_spec=pltpu.PrefetchScalarGridSpec(
                num_scalar_prefetch=0,
                grid=grid,
                in_specs=[
                    x_spec,
                    pl.BlockSpec((C, C), lambda b, j: (0, 0)),   # resident weight
                    pl.BlockSpec((C, 1), lambda b, j: (0, 0)),   # resident bias
                ],
                out_specs=o_spec,
            ),
            compiler_params=cparams,
            cost_estimate=cost,
        )(x3, w_mat, b_col)

    return out3.reshape(B, C, H, W)               # pure reshape back to NCHW


def _reference(x_nchw, weight, bias):
    # Pure-JAX reference of the PyTorch forward (1x1 conv + sigmoid gate).
    B, C, H, W = x_nchw.shape
    w = weight.reshape(C, C)
    logits = jnp.einsum('bchw,oc->bohw', x_nchw, w) + bias[None, :, None, None]
    return x_nchw * jax.nn.sigmoid(logits)


if __name__ == "__main__":
    key = jax.random.PRNGKey(0)
    k_x, k_w, k_b = jax.random.split(key, 3)

    B, C, H, W = 2, 4, 16, 16
    x = jax.random.normal(k_x, (B, C, H, W), dtype=jnp.float32)

    # Deterministic parameter init matching nn.Conv2d(channels, channels, 1) shapes.
    fan_in = C  # kernel_size=1
    bound = 1.0 / jnp.sqrt(fan_in)
    weight = jax.random.uniform(k_w, (C, C, 1, 1), minval=-bound, maxval=bound,
                                dtype=jnp.float32)
    bias = jax.random.uniform(k_b, (C,), minval=-bound, maxval=bound,
                              dtype=jnp.float32)

    out = attention_layer(x, weight, bias)
    out = jax.block_until_ready(out)

    ref = _reference(x, weight, bias)
    assert out.shape == (B, C, H, W)
    assert jnp.allclose(out, ref, atol=1e-5, rtol=1e-5)

    print("KERNEL_OK")
</pallas_src>

<mosaic_0001>
module attributes {stable_mosaic.version = 11 : i64} {
  func.func @_attention_kernel_vpu(%arg0: i32, %arg1: i32, %arg2: memref<16xf32, #tpu.memory_space<smem>>, %arg3: memref<4xf32, #tpu.memory_space<smem>>, %arg4: memref<1x4x256xf32, #tpu.memory_space<vmem>>, %arg5: memref<1x4x256xf32, #tpu.memory_space<vmem>>) attributes {dimension_semantics = [#tpu.dimension_semantics<parallel>, #tpu.dimension_semantics<parallel>], iteration_bounds = array<i64: 2, 1>, scalar_prefetch = 2 : i64, scratch_operands = 0 : i64, tpu.core_type = #tpu.core_type<tc>, window_params = [{transform_indices = @transform_0, window_bounds = array<i64: 1, 4, 256>}, {transform_indices = @transform_1, window_bounds = array<i64: 1, 4, 256>}]} {
    %c0 = arith.constant 0 : index
    %c0_0 = arith.constant 0 : index
    %c0_1 = arith.constant 0 : index
    %0 = vector.load %arg4[%c0, %c0_0, %c0_1] : memref<1x4x256xf32, #tpu.memory_space<vmem>>, vector<1x4x256xf32>
    %1 = vector.shape_cast %0 : vector<1x4x256xf32> to vector<4x256xf32>
    %2 = vector.extract_strided_slice %1 {offsets = [0, 0], sizes = [1, 256], strides = [1, 1]} : vector<4x256xf32> to vector<1x256xf32>
    %c0_2 = arith.constant 0 : index
    %3 = memref.load %arg2[%c0_2] : memref<16xf32, #tpu.memory_space<smem>>
    %4 = vector.broadcast %3 : f32 to vector<1x256xf32>
    %5 = arith.mulf %2, %4 : vector<1x256xf32>
    %6 = vector.extract_strided_slice %1 {offsets = [1, 0], sizes = [1, 256], strides = [1, 1]} : vector<4x256xf32> to vector<1x256xf32>
    %c1 = arith.constant 1 : index
    %7 = memref.load %arg2[%c1] : memref<16xf32, #tpu.memory_space<smem>>
    %8 = vector.broadcast %7 : f32 to vector<1x256xf32>
    %9 = arith.mulf %6, %8 : vector<1x256xf32>
    %10 = arith.addf %5, %9 : vector<1x256xf32>
    %11 = vector.extract_strided_slice %1 {offsets = [2, 0], sizes = [1, 256], strides = [1, 1]} : vector<4x256xf32> to vector<1x256xf32>
    %c2 = arith.constant 2 : index
    %12 = memref.load %arg2[%c2] : memref<16xf32, #tpu.memory_space<smem>>
    %13 = vector.broadcast %12 : f32 to vector<1x256xf32>
    %14 = arith.mulf %11, %13 : vector<1x256xf32>
    %15 = arith.addf %10, %14 : vector<1x256xf32>
    %16 = vector.extract_strided_slice %1 {offsets = [3, 0], sizes = [1, 256], strides = [1, 1]} : vector<4x256xf32> to vector<1x256xf32>
    %c3 = arith.constant 3 : index
    %17 = memref.load %arg2[%c3] : memref<16xf32, #tpu.memory_space<smem>>
    %18 = vector.broadcast %17 : f32 to vector<1x256xf32>
    %19 = arith.mulf %16, %18 : vector<1x256xf32>
    %20 = arith.addf %15, %19 : vector<1x256xf32>
    %c0_3 = arith.constant 0 : index
    %21 = memref.load %arg3[%c0_3] : memref<4xf32, #tpu.memory_space<smem>>
    %22 = vector.broadcast %21 : f32 to vector<1x256xf32>
    %23 = arith.addf %20, %22 : vector<1x256xf32>
    %24 = vector.extract_strided_slice %1 {offsets = [0, 0], sizes = [1, 256], strides = [1, 1]} : vector<4x256xf32> to vector<1x256xf32>
    %25 = arith.negf %23 : vector<1x256xf32>
    %26 = math.exp %25 : vector<1x256xf32>
    %cst = arith.constant 1.000000e+00 : f32
    %27 = vector.broadcast %cst : f32 to vector<1x256xf32>
    %28 = arith.addf %27, %26 : vector<1x256xf32>
    %29 = arith.divf %27, %28 : vector<1x256xf32>
    %30 = arith.mulf %24, %29 : vector<1x256xf32>
    %31 = vector.extract_strided_slice %1 {offsets = [0, 0], sizes = [1, 256], strides = [1, 1]} : vector<4x256xf32> to vector<1x256xf32>
    %c4 = arith.constant 4 : index
    %32 = memref.load %arg2[%c4] : memref<16xf32, #tpu.memory_space<smem>>
    %33 = vector.broadcast %32 : f32 to vector<1x256xf32>
    %34 = arith.mulf %31, %33 : vector<1x256xf32>
    %35 = vector.extract_strided_slice %1 {offsets = [1, 0], sizes = [1, 256], strides = [1, 1]} : vector<4x256xf32> to vector<1x256xf32>
    %c5 = arith.constant 5 : index
    %36 = memref.load %arg2[%c5] : memref<16xf32, #tpu.memory_space<smem>>
    %37 = vector.broadcast %36 : f32 to vector<1x256xf32>
    %38 = arith.mulf %35, %37 : vector<1x256xf32>
    %39 = arith.addf %34, %38 : vector<1x256xf32>
    %40 = vector.extract_strided_slice %1 {offsets = [2, 0], sizes = [1, 256], strides = [1, 1]} : vector<4x256xf32> to vector<1x256xf32>
    %c6 = arith.constant 6 : index
    %41 = memref.load %arg2[%c6] : memref<16xf32, #tpu.memory_space<smem>>
    %42 = vector.broadcast %41 : f32 to vector<1x256xf32>
    %43 = arith.mulf %40, %42 : vector<1x256xf32>
    %44 = arith.addf %39, %43 : vector<1x256xf32>
    %45 = vector.extract_strided_slice %1 {offsets = [3, 0], sizes = [1, 256], strides = [1, 1]} : vector<4x256xf32> to vector<1x256xf32>
    %c7 = arith.constant 7 : index
    %46 = memref.load %arg2[%c7] : memref<16xf32, #tpu.memory_space<smem>>
    %47 = vector.broadcast %46 : f32 to vector<1x256xf32>
    %48 = arith.mulf %45, %47 : vector<1x256xf32>
    %49 = arith.addf %44, %48 : vector<1x256xf32>
    %c1_4 = arith.constant 1 : index
    %50 = memref.load %arg3[%c1_4] : memref<4xf32, #tpu.memory_space<smem>>
    %51 = vector.broadcast %50 : f32 to vector<1x256xf32>
    %52 = arith.addf %49, %51 : vector<1x256xf32>
    %53 = vector.extract_strided_slice %1 {offsets = [1, 0], sizes = [1, 256], strides = [1, 1]} : vector<4x256xf32> to vector<1x256xf32>
    %54 = arith.negf %52 : vector<1x256xf32>
    %55 = math.exp %54 : vector<1x256xf32>
    %cst_5 = arith.constant 1.000000e+00 : f32
    %56 = vector.broadcast %cst_5 : f32 to vector<1x256xf32>
    %57 = arith.addf %56, %55 : vector<1x256xf32>
    %58 = arith.divf %56, %57 : vector<1x256xf32>
    %59 = arith.mulf %53, %58 : vector<1x256xf32>
    %60 = vector.extract_strided_slice %1 {offsets = [0, 0], sizes = [1, 256], strides = [1, 1]} : vector<4x256xf32> to vector<1x256xf32>
    %c8 = arith.constant 8 : index
    %61 = memref.load %arg2[%c8] : memref<16xf32, #tpu.memory_space<smem>>
    %62 = vector.broadcast %61 : f32 to vector<1x256xf32>
    %63 = arith.mulf %60, %62 : vector<1x256xf32>
    %64 = vector.extract_strided_slice %1 {offsets = [1, 0], sizes = [1, 256], strides = [1, 1]} : vector<4x256xf32> to vector<1x256xf32>
    %c9 = arith.constant 9 : index
    %65 = memref.load %arg2[%c9] : memref<16xf32, #tpu.memory_space<smem>>
    %66 = vector.broadcast %65 : f32 to vector<1x256xf32>
    %67 = arith.mulf %64, %66 : vector<1x256xf32>
    %68 = arith.addf %63, %67 : vector<1x256xf32>
    %69 = vector.extract_strided_slice %1 {offsets = [2, 0], sizes = [1, 256], strides = [1, 1]} : vector<4x256xf32> to vector<1x256xf32>
    %c10 = arith.constant 10 : index
    %70 = memref.load %arg2[%c10] : memref<16xf32, #tpu.memory_space<smem>>
    %71 = vector.broadcast %70 : f32 to vector<1x256xf32>
    %72 = arith.mulf %69, %71 : vector<1x256xf32>
    %73 = arith.addf %68, %72 : vector<1x256xf32>
    %74 = vector.extract_strided_slice %1 {offsets = [3, 0], sizes = [1, 256], strides = [1, 1]} : vector<4x256xf32> to vector<1x256xf32>
    %c11 = arith.constant 11 : index
    %75 = memref.load %arg2[%c11] : memref<16xf32, #tpu.memory_space<smem>>
    %76 = vector.broadcast %75 : f32 to vector<1x256xf32>
    %77 = arith.mulf %74, %76 : vector<1x256xf32>
    %78 = arith.addf %73, %77 : vector<1x256xf32>
    %c2_6 = arith.constant 2 : index
    %79 = memref.load %arg3[%c2_6] : memref<4xf32, #tpu.memory_space<smem>>
    %80 = vector.broadcast %79 : f32 to vector<1x256xf32>
    %81 = arith.addf %78, %80 : vector<1x256xf32>
    %82 = vector.extract_strided_slice %1 {offsets = [2, 0], sizes = [1, 256], strides = [1, 1]} : vector<4x256xf32> to vector<1x256xf32>
    %83 = arith.negf %81 : vector<1x256xf32>
    %84 = math.exp %83 : vector<1x256xf32>
    %cst_7 = arith.constant 1.000000e+00 : f32
    %85 = vector.broadcast %cst_7 : f32 to vector<1x256xf32>
    %86 = arith.addf %85, %84 : vector<1x256xf32>
    %87 = arith.divf %85, %86 : vector<1x256xf32>
    %88 = arith.mulf %82, %87 : vector<1x256xf32>
    %89 = vector.extract_strided_slice %1 {offsets = [0, 0], sizes = [1, 256], strides = [1, 1]} : vector<4x256xf32> to vector<1x256xf32>
    %c12 = arith.constant 12 : index
    %90 = memref.load %arg2[%c12] : memref<16xf32, #tpu.memory_space<smem>>
    %91 = vector.broadcast %90 : f32 to vector<1x256xf32>
    %92 = arith.mulf %89, %91 : vector<1x256xf32>
    %93 = vector.extract_strided_slice %1 {offsets = [1, 0], sizes = [1, 256], strides = [1, 1]} : vector<4x256xf32> to vector<1x256xf32>
    %c13 = arith.constant 13 : index
    %94 = memref.load %arg2[%c13] : memref<16xf32, #tpu.memory_space<smem>>
    %95 = vector.broadcast %94 : f32 to vector<1x256xf32>
    %96 = arith.mulf %93, %95 : vector<1x256xf32>
    %97 = arith.addf %92, %96 : vector<1x256xf32>
    %98 = vector.extract_strided_slice %1 {offsets = [2, 0], sizes = [1, 256], strides = [1, 1]} : vector<4x256xf32> to vector<1x256xf32>
    %c14 = arith.constant 14 : index
    %99 = memref.load %arg2[%c14] : memref<16xf32, #tpu.memory_space<smem>>
    %100 = vector.broadcast %99 : f32 to vector<1x256xf32>
    %101 = arith.mulf %98, %100 : vector<1x256xf32>
    %102 = arith.addf %97, %101 : vector<1x256xf32>
    %103 = vector.extract_strided_slice %1 {offsets = [3, 0], sizes = [1, 256], strides = [1, 1]} : vector<4x256xf32> to vector<1x256xf32>
    %c15 = arith.constant 15 : index
    %104 = memref.load %arg2[%c15] : memref<16xf32, #tpu.memory_space<smem>>
    %105 = vector.broadcast %104 : f32 to vector<1x256xf32>
    %106 = arith.mulf %103, %105 : vector<1x256xf32>
    %107 = arith.addf %102, %106 : vector<1x256xf32>
    %c3_8 = arith.constant 3 : index
    %108 = memref.load %arg3[%c3_8] : memref<4xf32, #tpu.memory_space<smem>>
    %109 = vector.broadcast %108 : f32 to vector<1x256xf32>
    %110 = arith.addf %107, %109 : vector<1x256xf32>
    %111 = vector.extract_strided_slice %1 {offsets = [3, 0], sizes = [1, 256], strides = [1, 1]} : vector<4x256xf32> to vector<1x256xf32>
    %112 = arith.negf %110 : vector<1x256xf32>
    %113 = math.exp %112 : vector<1x256xf32>
    %cst_9 = arith.constant 1.000000e+00 : f32
    %114 = vector.broadcast %cst_9 : f32 to vector<1x256xf32>
    %115 = arith.addf %114, %113 : vector<1x256xf32>
    %116 = arith.divf %114, %115 : vector<1x256xf32>
    %117 = arith.mulf %111, %116 : vector<1x256xf32>
    %118 = tpu.concatenate %30, %59, %88, %117 in 0 : vector<1x256xf32>, vector<1x256xf32>, vector<1x256xf32>, vector<1x256xf32> -> vector<4x256xf32>
    %c0_10 = arith.constant 0 : index
    %c0_11 = arith.constant 0 : index
    %c0_12 = arith.constant 0 : index
    %119 = vector.load %arg5[%c0_10, %c0_11, %c0_12] : memref<1x4x256xf32, #tpu.memory_space<vmem>>, vector<1x4x256xf32>
    %120 = vector.shape_cast %119 : vector<1x4x256xf32> to vector<4x256xf32>
    %121 = vector.shape_cast %118 : vector<4x256xf32> to vector<1x4x256xf32>
    tpu.vector_store %arg5[%c0_10, %c0_11, %c0_12], %121 {strides = array<i32>} : memref<1x4x256xf32, #tpu.memory_space<vmem>>, vector<1x4x256xf32>,
    return
  }
  func.func @transform_0(%arg0: i32, %arg1: i32, %arg2: memref<16xf32, #tpu.memory_space<smem>>, %arg3: memref<4xf32, #tpu.memory_space<smem>>) -> (i32, i32, i32) {
    %c0_i32 = arith.constant 0 : i32
    %c0_i32_0 = arith.constant 0 : i32
    return %arg0, %c0_i32, %arg1 : i32, i32, i32
  }
  func.func @transform_1(%arg0: i32, %arg1: i32, %arg2: memref<16xf32, #tpu.memory_space<smem>>, %arg3: memref<4xf32, #tpu.memory_space<smem>>) -> (i32, i32, i32) {
    %c0_i32 = arith.constant 0 : i32
    %c0_i32_0 = arith.constant 0 : i32
    return %arg0, %c0_i32, %arg1 : i32, i32, i32
  }
}

</mosaic_0001>

<bundles_post_ra>
// kernel: tpu_custom_call.1
= control target key start
LH: loop header
LB: loop body
LE: loop exit
PB: predicated region body
PF: predicated region fallthrough
CT: control target
= control target key end

     0   :  { %s790_s18 = smov [#allocation3]   ;;  %s791_s19 = smov [#allocation4]   ;;  %s985_s0 = inlined_call_operand.hbm [shape: f32[16], index: 0, kind: input, shape index: {}]   ;;  %s986_s2 = inlined_call_operand.hbm [shape: f32[2,4,256], index: 2, kind: input, shape index: {}]   ;;  %s987_s3 = inlined_call_operand.hbm [shape: f32[2,4,256], index: 3, kind: output, shape index: {}]   ;;  %s988_s1 = inlined_call_operand.hbm [shape: f32[4], index: 1, kind: input, shape index: {}]  }
   0x1   :  { %s9_s14 = sshll.u32 %s985_s0, 4  ;;  %s14_s17 = sshll.u32 %s988_s1, 4  ;;  %s10_s14 = int_to_ptr.hbm [resolvable:$true] %s9_s14  ;;  %s15_s17 = int_to_ptr.hbm [resolvable:$true] %s14_s17 }
   0x2   :  { %12 = dma.hbm_to_smem %s10_s14, 16, %s790_s18, [#allocation2] }
   0x3   :  { %17 = dma.hbm_to_smem %s15_s17, 16, %s791_s19, [#allocation2] }
   0x4   :  { %756 = dma.done.wait [#allocation2], 32 }
   0x5   :  { %757 = vsyncadd [#allocation2], 4294967264 }
   0x6   :  { %20 = sfence }
   0x7   :  { %21 = vsyncpa [#allocation6], 0 }
   0x8   :  { %23 = vsyncpa [#allocation6 + $0x1], 0 }
   0x9   :  { %24 = vsyncpa [#allocation7], 0 }
   0xa   :  { %26 = vsyncpa [#allocation7 + $0x1], 0  ;;  %s818_s20 = smov 0   ;;  %s820_s0 = smov 0  }
   0xb   :  { %s822_s21 = smov 0   ;;  %s824_s1 = smov 0  }
   0xc   :  { %s826_s22 = smov 0   ;;  %s828_s23 = smov 0  }
   0xd LB: > { %s519_s24 = sadd.s32 4294967295, %s788_s23   ;;  %s520_s25 = sadd.s32 4294967294, %s788_s23   ;;  %s788_s23 = sphi %s828_s23, %s32_s23   ;;  %s784_s22 = sphi %s826_s22, %s1001_s22   ;;  %s780_s1 = sphi %s824_s1, %s1000_s1   ;;  %s776_s21 = sphi %s822_s21, %s999_s21   ;;  %s772_s0 = sphi %s820_s0, %s998_s0   ;;  %s768_s20 = sphi %s818_s20, %s997_s20  }
   0xe   : > { %s44_s26 = sadd.s32 1, %s784_s22  ;;  %s53_s27 = sadd.s32 1, %s776_s21 }
   0xf   : > { %p46_p0 = scmp.ge.s32.totalorder %s44_s26, 2  ;;  %p60_p1 = scmp.ne.s32.totalorder %s776_s21, %s772_s0 }
  0x10   : > { %p61_p2 = scmp.eq.s32.totalorder %s788_s23, 0  ;;  %p66_p3 = scmp.ne.s32.totalorder %s772_s0, %s768_s20 }
  0x11   : > { %s1003_s26 = smov (%p46_p0, %s44_s26), 0  ;;  %p67_p5 = scmp.eq.s32.totalorder %s519_s24, 0 }
  0x12   : > { %p859_p4 = por %p61_p2, %p60_p1  ;;  %s48_s29 = ssub.s32 %s784_s22, %s1003_s26 }
  0x13   : > { %p92_p6 = scmp.eq.s32.totalorder %s519_s24, 1  ;;  %p51_p7 = scmp.eq.s32.totalorder %s48_s29, 0 }
  0x14   : > { %p865_p8 = por %p67_p5, %p66_p3  ;;  %p98_p10 = scmp.eq.s32.totalorder %s520_s25, 1 }
  0x15   : > { %p869_p9 = por %p92_p6, %p60_p1  ;;  %p522_p12 = scmp.ge.s32.totalorder %s788_s23, 2 }
  0x16   : > { %s874_s5 = scalar_select %p51_p7, %s776_s21, %s53_s27  }
  0x17   : > { %p876_p11 = por %p98_p10, %p66_p3  ;;  %p582_p13 = scmp.lt.s32.totalorder %s788_s23, 2 }
  0x18   : > { %s118_s7 = sand.u32 1, %s776_s21   ;;  %s568_s9 = sshll.u32 %s784_s22, 3 }
  0x19   : > { %s523_s8 = sshll.u32 %s118_s7, 3  ;;  %s129_s12 = scalar_lea.hbm %s986_s2, %s568_s9 }
  0x1a   : > { %s122_s13 = scalar_lea.vmem [#allocation5], %s523_s8  ;;  %s131_s15 = sshll.u32 %s129_s12, 4  ;;  %s132_s15 = int_to_ptr.hbm [resolvable:$true] %s131_s15 }
  0x1b   : > { %s133_s14 = sshll.u32 %s122_s13, 4  ;;  %p575_p0 = pnand %p582_p13, %p859_p4  ;;  %s134_s14 = int_to_ptr.vmem [resolvable:$true] %s133_s14 }
  0x1c   : > { %p526_p1 = scmp.ge.s32.totalorder %s788_s23, 1  ;;  %p138_p2 = scmp.lt.s32.totalorder %s788_s23, 3 }
  0x1d   : > { %s119_s16 = scalar_lea.sflag [#allocation6], %s118_s7 }
  0x1e   : > { %577 = dma.hbm_to_vmem [thread:$0]  (!%p575_p0), %s132_s15, 128, %s134_s14, %s119_s16  }
  0x1f   : > { %p139_p3 = pnand %p526_p1, %p138_p2 }
  0x20   : > { %s892_s17 = sand.u32 (!%p139_p3), 1, %s772_s0  }
  0x21   : > { %142 = sbr.rel (%p139_p3) target bundleno = 116 (0x74), region = 24  ;;  %s527_s18 = sshll.u32 (!%p139_p3), %s892_s17, 3 }
  0x22   : > { %s145_s19 = scalar_lea.sflag (!%p139_p3), [#allocation6], %s892_s17  ;;  %s148_s24 = scalar_lea.vmem (!%p139_p3), [#allocation5], %s527_s18 }
  0x26   : > { %759 = dma.done.wait (%p865_p8), %s145_s19, 128  }
  0x27   : > { %761 = vsyncadd (%p865_p8), %s145_s19, 4294967168  ;;  %s171_s25 = sld [smem:[#allocation3]]  ;;  %v904_v1 = vld [vmem:[%s148_s24] sm:$0xff] }
  0x28   : > { %s529_s27 = sld [smem:[#allocation3 + $0x1]] }
  0x29   : > { %s531_s28 = sld [smem:[#allocation3 + $0x2]] }
  0x2a   : > { %s533_s29 = sld [smem:[#allocation3 + $0x3]] }
  0x2b   : > { %s902_s7 = sld [smem:[#allocation4]] }
  0x2c   : > { %s536_s8 = sld [smem:[#allocation3 + $0x4]] }
  0x2d   : > { %v172_v0 = vstv %s171_s25  ;;  %s537_s9 = sld [smem:[#allocation3 + $0x5]] }
  0x2e   : > { %v175_v2 = vstv %s529_s27  ;;  %s539_s10 = sld [smem:[#allocation3 + $0x6]]  ;;  %v173_v3 = vmul.f32 %v172_v0, %v904_v1 }
  0x2f   : > { %v176_v4 = vmul.f32 %v175_v2, %v904_v1  ;;  %v183_v5 = vstv %s531_s28  ;;  %s541_s30 = sld [smem:[#allocation3 + $0x7]] }
  0x30   : > { %v184_v6 = vmul.f32 %v183_v5, %v904_v1  ;;  %v191_v7 = vstv %s533_s29  ;;  %s909_s11 = sld [smem:[#allocation4 + $0x1]]  ;;  %s569_s29 = sshll.u32 %s780_s1, 3 }
  0x31   : > { %v530_v8 = vrot.slane %v176_v4, 9  ;;  %v192_v9 = vmul.f32 %v191_v7, %v904_v1  ;;  %s545_s12 = sld [smem:[#allocation3 + $0x8]]  ;;  %v199_v21 = vstv %s902_s7 }
  0x32   : > { %v532_v10 = vrot.slane %v184_v6, 10  ;;  %v222_v11 = vstv %s536_s8  ;;  %s546_s13 = sld [smem:[#allocation3 + $0x9]] }
  0x33   : > { %v181_v12 = vadd.f32 %v530_v8, %v173_v3  ;;  %v534_v13 = vrot.slane %v192_v9, 11  ;;  %v225_v14 = vstv %s537_s9  ;;  %s548_s14 = sld [smem:[#allocation3 + $0xa]]  ;;  %v223_v15 = vmul.f32 %v222_v11, %v904_v1  ;;  %s430_s9 = scalar_lea.hbm %s987_s3, %s569_s29 }
  0x34   : > { %v226_v16 = vmul.f32 %v225_v14, %v904_v1  ;;  %v233_v17 = vstv %s539_s10  ;;  %s550_s15 = sld [smem:[#allocation3 + $0xb]]  ;;  %s167_s10 = scalar_lea.vmem [#allocation8], %s527_s18 }
  0x35   : > { %v189_v18 = vadd.f32 %v532_v10, %v181_v12  ;;  %v234_v19 = vmul.f32 %v233_v17, %v904_v1  ;;  %v241_v20 = vstv %s541_s30  ;;  %s915_s16 = sld [smem:[#allocation4 + $0x2]]  ;;  %s432_s1 = sshll.u32 %s167_s10, 4  ;;  %s433_s1 = int_to_ptr.vmem [resolvable:$true] %s432_s1 }
  0x36   : > { %v538_v22 = vrot.slane %v226_v16, 9  ;;  %v242_v23 = vmul.f32 %v241_v20, %v904_v1  ;;  %s554_s19 = sld [smem:[#allocation3 + $0xc]]  ;;  %v249_v38 = vstv %s909_s11  ;;  %s434_s30 = sshll.u32 %s430_s9, 4  ;;  %s435_s30 = int_to_ptr.hbm [resolvable:$true] %s434_s30 }
  0x37   : > { %v197_v24 = vadd.f32 %v534_v13, %v189_v18  ;;  %v540_v25 = vrot.slane %v234_v19, 10  ;;  %v275_v26 = vstv %s545_s12  ;;  %s555_s24 = sld [smem:[#allocation3 + $0xd]]  ;;  %s417_s11 = scalar_lea.sflag [#allocation7], %s892_s17 }
  0x38   : > { %v231_v27 = vadd.f32 %v538_v22, %v223_v15  ;;  %v542_v28 = vrot.slane %v242_v23, 11  ;;  %v278_v29 = vstv %s546_s13  ;;  %s557_s25 = sld [smem:[#allocation3 + $0xe]]  ;;  %v276_v31 = vmul.f32 %v275_v26, %v904_v1  ;;  %s718_s12 = sshra.s32 %s435_s30, 4  ;;  %s719_s12 = int_to_ptr.hbm [resolvable:$true] %s718_s12 }
  0x39   : > { %v200_v30 = vadd.f32 %v199_v21, %v197_v24  ;;  %v279_v32 = vmul.f32 %v278_v29, %v904_v1  ;;  %v286_v33 = vstv %s548_s14  ;;  %s559_s27 = sld [smem:[#allocation3 + $0xf]]  ;;  %s720_s13 = scalar_lea.hbm %s719_s12, 8 }
  0x3a   : > { %v239_v34 = vadd.f32 %v540_v25, %v231_v27  ;;  %v287_v35 = vmul.f32 %v286_v33, %v904_v1  ;;  %v294_v36 = vstv %s550_s15  ;;  %s561_s28 = sld [smem:[#allocation4 + $0x3]]  ;;  %p721_p4 = scmp.ne.s32.totalorder %s719_s12, %s720_s13 }
  0x3b   : > { %v535_v37 = vmul.f32 -1.442695, %v200_v30  ;;  %v547_v39 = vrot.slane %v279_v32, 9  ;;  %v295_v40 = vmul.f32 %v294_v36, %v904_v1  ;;  %v302_v55 = vstv %s915_s16  ;;  %s724_s15 = scalar_lea.hbm %s987_s3, 16  ;;  %p725_p7 = scmp.lt.s32.totalorder %s719_s12, %s987_s3 }
  0x3c   : > { %v247_v41 = vadd.f32 %v542_v28, %v239_v34  ;;  %v549_v42 = vrot.slane %v287_v35, 10  ;;  %v328_v43 = vstv %s554_s19  ;;  %p722_p5 = pnand %p721_p4, %p869_p9  ;;  %p726_p8 = scmp.lt.s32.totalorder %s724_s15, %s720_s13 }
  0x3d   : > { %634 = vpow2.f32 %v535_v37  ;;  %v284_v44 = vadd.f32 %v547_v39, %v276_v31  ;;  %v551_v45 = vrot.slane %v295_v40, 11  ;;  %v329_v47 = vmul.f32 %v328_v43, %v904_v1 }
  0x3e   : > { %v250_v46 = vadd.f32 %v249_v38, %v247_v41  ;;  %v331_v48 = vstv %s555_s24  ;;  %v339_v49 = vstv %s557_s25  ;;  %p723_p6 = pneg %p722_p5  ;;  %p727_p10 = por %p726_p8, %p725_p7 }
  0x3f   : > { %v292_v50 = vadd.f32 %v549_v42, %v284_v44  ;;  %v332_v51 = vmul.f32 %v331_v48, %v904_v1  ;;  %v340_v52 = vmul.f32 %v339_v49, %v904_v1  ;;  %v347_v53 = vstv %s559_s27 }
  0x40   : > { %v544_v54 = vmul.f32 -1.442695, %v250_v46  ;;  %v348_v56 = vmul.f32 %v347_v53, %v904_v1  ;;  %v355_v4 = vstv %s561_s28  ;;  %p728_p13 = pnand %p727_p10, %p723_p6 }
  0x41   : > { %v300_v57 = vadd.f32 %v551_v45, %v292_v50  ;;  %v556_v58 = vrot.slane %v332_v51, 9  ;;  %v558_v59 = vrot.slane %v340_v52, 10 }
  0x42   : > { %636 = vpow2.f32 %v544_v54  ;;  %v560_v63 = vrot.slane %v348_v56, 11 }
  0x43   : > { %v635_v60 = vpop.eup %634  ;;  %v303_v61 = vadd.f32 %v302_v55, %v300_v57  ;;  %v337_v62 = vadd.f32 %v556_v58, %v329_v47 }
  0x44   : > { %v204_v0 = vadd.f32 1.0, %v635_v60 }
  0x45   : > { %v553_v2 = vmul.f32 -1.442695, %v303_v61  ;;  %v345_v3 = vadd.f32 %v558_v59, %v337_v62 }
  0x46   : > { %638 = vrcp.f32 %v204_v0  ;;  %vm210_vm0 = vweird.f32 %v204_v0  ;;  %v214_v17 = vand.u32 2147483647, %v204_v0  ;;  %v216_v19 = vand.u32 2147483648, %v204_v0 }
  0x47   : > { %640 = vpow2.f32 %v553_v2  ;;  %v353_v5 = vadd.f32 %v560_v63, %v345_v3 }
  0x48   : > { %v637_v6 = vpop.eup %636  ;;  %vm933_vm5 = vcmp.eq.f32.partialorder %v214_v17, 8.507059e+37  ;;  %v217_v30 = vor.u32 1.1754944e-38, %v216_v19 }
  0x49   : > { %v254_v7 = vadd.f32 1.0, %v637_v6  ;;  %v356_v8 = vadd.f32 %v355_v4, %v353_v5 }
  0x4b   : > { %642 = vrcp.f32 %v254_v7  ;;  %v562_v10 = vmul.f32 -1.442695, %v356_v8  ;;  %vm260_vm2 = vweird.f32 %v254_v7  ;;  %v266_v20 = vand.u32 2147483648, %v254_v7 }
  0x4c   : > { %v639_v9 = vpop.eup %638  ;;  %v264_v24 = vand.u32 2147483647, %v254_v7 }
  0x4d   : > { %v641_v11 = vpop.eup %640  ;;  %v206_v12 = vmul.f32 %v639_v9, %v204_v0  ;;  %644 = vpow2.f32 %v562_v10  ;;  %vm211_vm1 = vweird.f32 %v639_v9  ;;  %v267_v31 = vor.u32 1.1754944e-38, %v266_v20 }
  0x4e   : > { %v307_v13 = vadd.f32 1.0, %v641_v11  ;;  %vm929_vm4 = vmor %vm210_vm0, %vm211_vm1  ;;  %vm265_vm7 = vcmp.eq.f32.partialorder %v264_v24, 8.507059e+37  ;;  %vm400_vm0 = vcmask 1040384   ;;  %vm403_vm1 = vcmask 1041408  }
  0x4f   : > { %v207_v14 = vsub.f32 1.0, %v206_v12 }
  0x50   : > { %646 = vrcp.f32 %v307_v13  ;;  %v319_v35 = vand.u32 2147483648, %v307_v13  ;;  %vm313_vm8 = vweird.f32 %v307_v13  ;;  %v317_v37 = vand.u32 2147483647, %v307_v13 }
  0x51   : > { %v643_v15 = vpop.eup %642  ;;  %v208_v16 = vmul.f32 %v639_v9, %v207_v14 }
  0x52   : > { %v256_v18 = vmul.f32 %v643_v15, %v254_v7  ;;  %vm261_vm3 = vweird.f32 %v643_v15  ;;  %v320_v43 = vor.u32 1.1754944e-38, %v319_v35  ;;  %vm318_vm11 = vcmp.eq.f32.partialorder %v317_v37, 8.507059e+37 }
  0x53   : > { %v645_v21 = vpop.eup %644  ;;  %v209_v22 = vadd.f32 %v639_v9, %v208_v16  ;;  %vm262_vm6 = vmor %vm260_vm2, %vm261_vm3  ;;  %vm406_vm2 = vcmask 1042432   ;;  %vm412_vm3 = vcmask 1043456  }
  0x54   : > { %v257_v23 = vsub.f32 1.0, %v256_v18  ;;  %v360_v26 = vadd.f32 1.0, %v645_v21 }
  0x55   : > { %v213_v33 = vsel %vm929_vm4, %v639_v9, %v209_v22 }
  0x56   : > { %v647_v27 = vpop.eup %646  ;;  %v258_v29 = vmul.f32 %v643_v15, %v257_v23  ;;  %648 = vrcp.f32 %v360_v26  ;;  %v218_v39 = vsel %vm933_vm5, %v217_v30, %v213_v33  ;;  %vm366_vm12 = vweird.f32 %v360_v26 }
  0x57   : > { %v309_v32 = vmul.f32 %v647_v27, %v307_v13  ;;  %vm314_vm9 = vweird.f32 %v647_v27  ;;  %v220_v46 = vmul.f32 %v218_v39, %v904_v1  ;;  %v370_v49 = vand.u32 2147483647, %v360_v26 }
  0x58   : > { %v259_v34 = vadd.f32 %v643_v15, %v258_v29  ;;  %vm315_vm10 = vmor %vm313_vm8, %vm314_vm9  ;;  %v372_v50 = vand.u32 2147483648, %v360_v26 }
  0x59   : > { %v310_v36 = vsub.f32 1.0, %v309_v32  ;;  %v381_v58 = vperm.slane %v220_v46, 0  ;;  %v382_v59 = vperm.slane %v220_v46, 4  ;;  %vm371_vm15 = vcmp.eq.f32.partialorder %v370_v49, 8.507059e+37 }
  0x5a   : > { %v263_v38 = vsel %vm262_vm6, %v643_v15, %v259_v34  ;;  %v373_v57 = vor.u32 1.1754944e-38, %v372_v50 }
  0x5b   : > { %v268_v40 = vsel %vm265_vm7, %v267_v31, %v263_v38  ;;  %v311_v41 = vmul.f32 %v647_v27, %v310_v36 }
  0x5c   : > { %v271_v42 = vrot.slane %v268_v40, 7  ;;  %v649_v44 = vpop.eup %648 }
  0x5d   : > { %v312_v45 = vadd.f32 %v647_v27, %v311_v41  ;;  %v362_v47 = vmul.f32 %v649_v44, %v360_v26  ;;  %vm367_vm13 = vweird.f32 %v649_v44 }
  0x5e   : > { %v273_v51 = vmul.f32 %v271_v42, %v904_v1  ;;  %vm368_vm14 = vmor %vm366_vm12, %vm367_vm13 }
  0x5f   : > { %v316_v48 = vsel %vm315_vm10, %v647_v27, %v312_v45  ;;  %v363_v53 = vsub.f32 1.0, %v362_v47 }
  0x60   : > { %v321_v52 = vsel %vm318_vm11, %v320_v43, %v316_v48  ;;  %v386_v61 = vperm.slane %v273_v51, 1  ;;  %v387_v62 = vperm.slane %v273_v51, 5 }
  0x61   : > { %v324_v54 = vrot.slane %v321_v52, 6  ;;  %v364_v55 = vmul.f32 %v649_v44, %v363_v53 }
  0x62   : > { %v401_v5 = vsel %vm400_vm0, %v381_v58, %v386_v61  ;;  %v402_v6 = vsel %vm400_vm0, %v382_v59, %v387_v62 }
  0x63   : > { %v326_v56 = vmul.f32 %v324_v54, %v904_v1  ;;  %v365_v60 = vadd.f32 %v649_v44, %v364_v55 }
  0x65   : > { %v369_v63 = vsel %vm368_vm14, %v649_v44, %v365_v60  ;;  %v391_v2 = vperm.slane %v326_v56, 2  ;;  %v392_v3 = vperm.slane %v326_v56, 6 }
  0x66   : > { %v374_v0 = vsel %vm371_vm15, %v373_v57, %v369_v63 }
  0x67   : > { %v377_v4 = vrot.slane %v374_v0, 5  ;;  %v404_v8 = vsel %vm403_vm1, %v401_v5, %v391_v2  ;;  %v405_v9 = vsel %vm403_vm1, %v402_v6, %v392_v3 }
  0x69   : > { %v379_v7 = vmul.f32 %v377_v4, %v904_v1 }
  0x6b   : > { %v396_v10 = vperm.slane %v379_v7, 3  ;;  %v397_v11 = vperm.slane %v379_v7, 7 }
  0x6d   : > { %v407_v12 = vsel %vm406_vm2, %v404_v8, %v396_v10  ;;  %v408_v13 = vsel %vm406_vm2, %v405_v9, %v397_v11 }
  0x6e   : > { %v411_v14 = vrot.slane %v408_v13, 4 }
  0x70   : > { %v413_v1 = vsel %vm412_vm3, %v407_v12, %v411_v14 }
  0x71   : > { %415 = vst [vmem:[%s167_s10] sm:$0xff] %v413_v1 }
  0x72   : > { %731 = shalt.err (!%p728_p13)
}
  0x73   : > { %572 = dma.vmem_to_hbm [thread:$0]  (%p869_p9), %s433_s1, 128, %s435_s30, %s417_s11  }
  0x74 PF: > { %s446_s17 = sand.u32 1, %s768_s20   ;;  %p579_p0 = pnand %p522_p12, %p876_p11 }
  0x75   : > { %s447_s24 = scalar_lea.sflag [#allocation7], %s446_s17 }
  0x76   : > { %p580_p1 = pneg %p579_p0 }
  0x78   : > { %763 = dma.done.wait (%p580_p1), %s447_s24, 128  }
  0x79   : > { %765 = vsyncadd (%p580_p1), %s447_s24, 4294967168  ;;  %s32_s23 = sadd.s32 1, %s788_s23   ;;  %s997_s20 = smov %s772_s0 }
  0x7a   : > { %p29_p2 = scmp.ge.s32.totalorder %s32_s23, 4   ;;  %s998_s0 = smov %s776_s21 }
  0x7b   : > { %s999_s21 = smov %s874_s5  ;;  %s1000_s1 = smov %s784_s22 }
  0x7c   : > { %s1001_s22 = smov %s1003_s26  ;;  %31 = sbr.rel (!%p29_p2) target bundleno = 13 (0xd), region = 69 }
  0x81   :  { %453 = vsyncpa [#allocation6], 1 }
  0x82   :  { %455 = vsyncpa [#allocation6 + $0x1], 1 }
  0x83   :  { %456 = vsyncpa [#allocation7], 1 }
  0x84   :  { %458 = vsyncpa [#allocation7 + $0x1], 1 }

</bundles_post_ra>
